<compile_context>
chip_gen: v6e
topology: v6e:2x2x1
jax: 0.10.0
libtpu: 0.0.40
codegen_flags: <defaults>
</compile_context>

<pallas_src>
import functools

import jax
import jax.numpy as jnp
import numpy as np
from jax.experimental import pallas as pl
from jax.experimental.pallas import tpu as pltpu

# Spatial masks (identical to the PyTorch module).
_MASK_Q = np.array([[1, 1, 0], [1, 0, 0], [0, 0, 0]], dtype=np.float32)
_MASK_E = np.array([[0, 1, 1], [0, 0, 1], [0, 0, 0]], dtype=np.float32)
_MASK_D = np.array([[0, 0, 0], [0, 0, 0], [1, 1, 1]], dtype=np.float32)

# Union of taps that survive at least one mask (center (1,1) is zero in all
# three masks and is skipped).  Order defines the fused K-axis layout.
_TAPS = ((0, 0), (0, 1), (0, 2), (1, 0), (1, 2), (2, 0), (2, 1), (2, 2))

_COMPUTE_DTYPE = jnp.bfloat16   # operand dtype (f32 accumulation on the MXU)
_OUT_DTYPE = jnp.bfloat16       # output store dtype (halves the binding HBM term)


# ------------------------------- Pallas kernel -------------------------------

def _qed_conv_kernel(x_ref, w_ref, b_ref, m_ref, oq_ref, oe_ref, od_ref, *,
                     th, w_img, cout, n_htiles, taps):
    """One grid step = one batch element x one H-tile of `th` output rows.

    x_ref : [1, Cin, (H+2)*W + 2]  bf16  (H-padded image, flat spatial, +/-1 pad)
    w_ref : [3*Cout, 8*Cin]        bf16  (fused masked weight, tap-major K)
    b_ref : [3*Cout, 1]            f32
    m_ref : [2, th*W]              bf16  (edge masks: row j != 0, row j != W-1)
    o*_ref: [1, Cout, th*W]        bf16  (q / e / d outputs, flat spatial)
    """
    thw = th * w_img

    if n_htiles == 1:
        base = 0                                            # fully static slicing
    else:
        # Dynamic (but tile-aligned) lane offset for the H-tile's first row.
        base = pl.multiple_of(pl.program_id(1) * thw, thw)

    mask_l = m_ref[0:1, :]                                  # zeroes column j == 0
    mask_r = m_ref[1:2, :]                                  # zeroes column j == W-1

    # Mini im2col: the 8 taps are contiguous flat lane slices of the padded
    # image, stacked along the K (sublane) axis.
    cols = []
    for (kh, kw) in taps:
        win = x_ref[0, :, pl.ds(base + kh * w_img + kw, thw)]   # [Cin, th*W]
        if kw == 0:
            win = win * mask_l      # drop the value pulled from the previous row
        elif kw == 2:
            win = win * mask_r      # drop the value pulled from the next row
        cols.append(win)
    xs = jnp.concatenate(cols, axis=0)                          # [8*Cin, th*W]

    # Single MXU matmul, spatial on lanes: [3*Cout, 8*Cin] @ [8*Cin, th*W].
    acc = jnp.dot(w_ref[...], xs, preferred_element_type=jnp.float32)
    acc = acc + b_ref[...]                                      # lane broadcast

    oq_ref[0] = acc[:cout].astype(oq_ref.dtype)
    oe_ref[0] = acc[cout:2 * cout].astype(oe_ref.dtype)
    od_ref[0] = acc[2 * cout:].astype(od_ref.dtype)


# ------------------------------- JAX wrapper ---------------------------------

def _fused_weight(wq, we, wd):
    """[Cout,Cin,3,3] x3 (+ masks) -> fused [3*Cout, 8*Cin] (rows Q|E|D, tap-major cols)."""
    blocks = []
    for w, m in ((wq, _MASK_Q), (we, _MASK_E), (wd, _MASK_D)):
        w_m = w * jnp.asarray(m)[None, None, :, :]              # [Cout, Cin, 3, 3]
        taps = [w_m[:, :, kh, kw] for (kh, kw) in _TAPS]        # each [Cout, Cin]
        blocks.append(jnp.concatenate(taps, axis=1))            # [Cout, 8*Cin]
    return jnp.concatenate(blocks, axis=0)                      # [3*Cout, 8*Cin]


def _pick_h_tile(h, w):
    """Rows per grid step: whole image when small, else a divisor of H whose
    flat tile width th*W is a multiple of 128 (lane-dense output blocks)."""
    if h * w <= 8192:
        return h
    cands = [t for t in range(1, h + 1) if h % t == 0 and (t * w) % 128 == 0]
    if not cands:
        return h
    good = [t for t in cands if t * w <= 8192]
    return max(good) if good else min(cands)


@jax.jit
def qed_first_layer(x_nchw, wq, bq, we, be, wd, bd):
    """Returns [q_out, e_out, d_out], each NCHW [N, Cout, H, W] (bfloat16)."""
    n, cin, h, w = x_nchw.shape
    cout = wq.shape[0]
    k = len(_TAPS) * cin

    th = _pick_h_tile(h, w)
    n_htiles = h // th
    thw = th * w
    flat_len = (h + 2) * w + 2

    # Input prep (no transposes): pad H by 1, flatten (H+2, W) onto the lane
    # axis (free, row-major), then pad the flat axis by 1 element per side so
    # the extreme corner taps stay in-bounds.
    x = x_nchw.astype(_COMPUTE_DTYPE)
    x = jnp.pad(x, ((0, 0), (0, 0), (1, 1), (0, 0)))
    x = x.reshape(n, cin, (h + 2) * w)
    x = jnp.pad(x, ((0, 0), (0, 0), (1, 1)))                    # [N, Cin, flat_len]

    w_f = _fused_weight(wq, we, wd).astype(_COMPUTE_DTYPE)      # [3*Cout, K]
    b_f = jnp.concatenate([bq, be, bd]).reshape(3 * cout, 1)    # f32 [3*Cout, 1]

    # 0/1 masks killing the one wrong column per row that a flat slice of a
    # row-padded image picks up for the kw=0 / kw=2 taps (exact).
    col = np.arange(thw) % w
    edge = np.stack([col != 0, col != w - 1]).astype(np.float32)
    edge = jnp.asarray(edge, dtype=_COMPUTE_DTYPE)              # [2, th*W]

    kernel = functools.partial(_qed_conv_kernel, th=th, w_img=w, cout=cout,
                               n_htiles=n_htiles, taps=_TAPS)

    out_sds = jax.ShapeDtypeStruct((n, cout, h * w), _OUT_DTYPE)
    out_spec = pl.BlockSpec((1, cout, thw), lambda i, j: (i, 0, j))

    q, e, d = pl.pallas_call(
        kernel,
        out_shape=(out_sds, out_sds, out_sds),
        grid=(n, n_htiles),
        in_specs=[
            pl.BlockSpec((1, cin, flat_len), lambda i, j: (i, 0, 0)),
            pl.BlockSpec((3 * cout, k), lambda i, j: (0, 0)),
            pl.BlockSpec((3 * cout, 1), lambda i, j: (0, 0)),
            pl.BlockSpec((2, thw), lambda i, j: (0, 0)),
        ],
        out_specs=(out_spec, out_spec, out_spec),
        compiler_params=pltpu.CompilerParams(
            # N is the megacore-parallel axis: the per-batch input block is
            # reused across its H-tiles, so splitting cores on N avoids
            # duplicate input DMA on v7x.  32 MiB VMEM limit is safe on all gens.
            dimension_semantics=("parallel", "arbitrary"),
            vmem_limit_bytes=32 * 1024 * 1024,
        ),
    )(x, w_f, b_f, edge)

    # Free row-major reshapes back to NCHW; channels already split per module.
    return [q.reshape(n, cout, h, w),
            e.reshape(n, cout, h, w),
            d.reshape(n, cout, h, w)]


# ------------------------------ reference (XLA) -------------------------------

def _ref_conv(x_nchw, w_oihw, b, mask_33):
    w = w_oihw * mask_33[None, None, :, :]
    y = jax.lax.conv_general_dilated(
        x_nchw, w, window_strides=(1, 1), padding=((1, 1), (1, 1)),
        dimension_numbers=("NCHW", "OIHW", "NCHW"))
    return y + b.reshape(1, -1, 1, 1)


# ----------------------------------- main -------------------------------------

if __name__ == "__main__":
    N, Cin, Cout, H, W = 2, 4, 8, 16, 16

    key = jax.random.PRNGKey(0)
    kx, kwq, kbq, kwe, kbe, kwd, kbd = jax.random.split(key, 7)

    # Deterministic parameter init (Conv2d-shaped: [out_ch, in_ch, 3, 3] + bias).
    fan_in = Cin * 3 * 3
    bound = 1.0 / np.sqrt(fan_in)
    x = jax.random.normal(kx, (N, Cin, H, W), jnp.float32)
    wq = jax.random.uniform(kwq, (Cout, Cin, 3, 3), jnp.float32, -bound, bound)
    bq = jax.random.uniform(kbq, (Cout,), jnp.float32, -bound, bound)
    we = jax.random.uniform(kwe, (Cout, Cin, 3, 3), jnp.float32, -bound, bound)
    be = jax.random.uniform(kbe, (Cout,), jnp.float32, -bound, bound)
    wd = jax.random.uniform(kwd, (Cout, Cin, 3, 3), jnp.float32, -bound, bound)
    bd = jax.random.uniform(kbd, (Cout,), jnp.float32, -bound, bound)

    outs = qed_first_layer(x, wq, bq, we, be, wd, bd)
    outs = jax.block_until_ready(outs)

    # Verify against XLA's f32 conv (same masked-conv semantics as the PyTorch
    # module).  Tolerances reflect bf16 operands + bf16 output stores with f32
    # accumulation.
    refs = [
        _ref_conv(x, wq, bq, jnp.asarray(_MASK_Q)),
        _ref_conv(x, we, be, jnp.asarray(_MASK_E)),
        _ref_conv(x, wd, bd, jnp.asarray(_MASK_D)),
    ]
    for got, ref in zip(outs, refs):
        assert got.shape == (N, Cout, H, W)
        np.testing.assert_allclose(np.asarray(got.astype(jnp.float32)),
                                   np.asarray(ref),
                                   rtol=2e-2, atol=5e-2)

    print("KERNEL_OK")
</pallas_src>

<mosaic_0001>
module attributes {stable_mosaic.version = 11 : i64} {
  func.func @_qed_conv_kernel(%arg0: i32, %arg1: i32, %arg2: memref<1x4x290xbf16, #tpu.memory_space<vmem>>, %arg3: memref<24x32xbf16, #tpu.memory_space<vmem>>, %arg4: memref<24x1xf32, #tpu.memory_space<vmem>>, %arg5: memref<2x256xbf16, #tpu.memory_space<vmem>>, %arg6: memref<1x8x256xbf16, #tpu.memory_space<vmem>>, %arg7: memref<1x8x256xbf16, #tpu.memory_space<vmem>>, %arg8: memref<1x8x256xbf16, #tpu.memory_space<vmem>>) attributes {dimension_semantics = [#tpu.dimension_semantics<parallel>, #tpu.dimension_semantics<arbitrary>], iteration_bounds = array<i64: 2, 1>, scalar_prefetch = 0 : i64, scratch_operands = 0 : i64, tpu.core_type = #tpu.core_type<tc>, window_params = [{transform_indices = @transform_0, window_bounds = array<i64: 1, 4, 290>}, {pipeline_mode = #tpu.pipeline_mode<synchronous>, transform_indices = @transform_1, window_bounds = array<i64: 24, 32>}, {pipeline_mode = #tpu.pipeline_mode<synchronous>, transform_indices = @transform_2, window_bounds = array<i64: 24, 1>}, {pipeline_mode = #tpu.pipeline_mode<synchronous>, transform_indices = @transform_3, window_bounds = array<i64: 2, 256>}, {transform_indices = @transform_4, window_bounds = array<i64: 1, 8, 256>}, {transform_indices = @transform_5, window_bounds = array<i64: 1, 8, 256>}, {transform_indices = @transform_6, window_bounds = array<i64: 1, 8, 256>}]} {
    %c0 = arith.constant 0 : index
    %c0_0 = arith.constant 0 : index
    %0 = vector.load %arg5[%c0, %c0_0] : memref<2x256xbf16, #tpu.memory_space<vmem>>, vector<1x256xbf16>
    %c1 = arith.constant 1 : index
    %c0_1 = arith.constant 0 : index
    %1 = vector.load %arg5[%c1, %c0_1] : memref<2x256xbf16, #tpu.memory_space<vmem>>, vector<1x256xbf16>
    %c0_2 = arith.constant 0 : index
    %c0_3 = arith.constant 0 : index
    %c0_4 = arith.constant 0 : index
    %2 = vector.load %arg2[%c0_2, %c0_3, %c0_4] : memref<1x4x290xbf16, #tpu.memory_space<vmem>>, vector<1x4x256xbf16>
    %3 = vector.shape_cast %2 : vector<1x4x256xbf16> to vector<4x256xbf16>
    %4 = vector.broadcast %0 : vector<1x256xbf16> to vector<4x256xbf16>
    %5 = arith.mulf %3, %4 : vector<4x256xbf16>
    %c0_5 = arith.constant 0 : index
    %c0_6 = arith.constant 0 : index
    %c1_7 = arith.constant 1 : index
    %6 = vector.load %arg2[%c0_5, %c0_6, %c1_7] : memref<1x4x290xbf16, #tpu.memory_space<vmem>>, vector<1x4x256xbf16>
    %7 = vector.shape_cast %6 : vector<1x4x256xbf16> to vector<4x256xbf16>
    %c0_8 = arith.constant 0 : index
    %c0_9 = arith.constant 0 : index
    %c2 = arith.constant 2 : index
    %8 = vector.load %arg2[%c0_8, %c0_9, %c2] : memref<1x4x290xbf16, #tpu.memory_space<vmem>>, vector<1x4x256xbf16>
    %9 = vector.shape_cast %8 : vector<1x4x256xbf16> to vector<4x256xbf16>
    %10 = vector.broadcast %1 : vector<1x256xbf16> to vector<4x256xbf16>
    %11 = arith.mulf %9, %10 : vector<4x256xbf16>
    %c0_10 = arith.constant 0 : index
    %c0_11 = arith.constant 0 : index
    %c16 = arith.constant 16 : index
    %12 = vector.load %arg2[%c0_10, %c0_11, %c16] : memref<1x4x290xbf16, #tpu.memory_space<vmem>>, vector<1x4x256xbf16>
    %13 = vector.shape_cast %12 : vector<1x4x256xbf16> to vector<4x256xbf16>
    %14 = vector.broadcast %0 : vector<1x256xbf16> to vector<4x256xbf16>
    %15 = arith.mulf %13, %14 : vector<4x256xbf16>
    %c0_12 = arith.constant 0 : index
    %c0_13 = arith.constant 0 : index
    %c18 = arith.constant 18 : index
    %16 = vector.load %arg2[%c0_12, %c0_13, %c18] : memref<1x4x290xbf16, #tpu.memory_space<vmem>>, vector<1x4x256xbf16>
    %17 = vector.shape_cast %16 : vector<1x4x256xbf16> to vector<4x256xbf16>
    %18 = vector.broadcast %1 : vector<1x256xbf16> to vector<4x256xbf16>
    %19 = arith.mulf %17, %18 : vector<4x256xbf16>
    %c0_14 = arith.constant 0 : index
    %c0_15 = arith.constant 0 : index
    %c32 = arith.constant 32 : index
    %20 = vector.load %arg2[%c0_14, %c0_15, %c32] : memref<1x4x290xbf16, #tpu.memory_space<vmem>>, vector<1x4x256xbf16>
    %21 = vector.shape_cast %20 : vector<1x4x256xbf16> to vector<4x256xbf16>
    %22 = vector.broadcast %0 : vector<1x256xbf16> to vector<4x256xbf16>
    %23 = arith.mulf %21, %22 : vector<4x256xbf16>
    %c0_16 = arith.constant 0 : index
    %c0_17 = arith.constant 0 : index
    %c33 = arith.constant 33 : index
    %24 = vector.load %arg2[%c0_16, %c0_17, %c33] : memref<1x4x290xbf16, #tpu.memory_space<vmem>>, vector<1x4x256xbf16>
    %25 = vector.shape_cast %24 : vector<1x4x256xbf16> to vector<4x256xbf16>
    %c0_18 = arith.constant 0 : index
    %c0_19 = arith.constant 0 : index
    %c34 = arith.constant 34 : index
    %26 = vector.load %arg2[%c0_18, %c0_19, %c34] : memref<1x4x290xbf16, #tpu.memory_space<vmem>>, vector<1x4x256xbf16>
    %27 = vector.shape_cast %26 : vector<1x4x256xbf16> to vector<4x256xbf16>
    %28 = vector.broadcast %1 : vector<1x256xbf16> to vector<4x256xbf16>
    %29 = arith.mulf %27, %28 : vector<4x256xbf16>
    %30 = tpu.concatenate %5, %7, %11, %15, %19, %23, %25, %29 in 0 : vector<4x256xbf16>, vector<4x256xbf16>, vector<4x256xbf16>, vector<4x256xbf16>, vector<4x256xbf16>, vector<4x256xbf16>, vector<4x256xbf16>, vector<4x256xbf16> -> vector<32x256xbf16>
    %c0_20 = arith.constant 0 : index
    %c0_21 = arith.constant 0 : index
    %31 = vector.load %arg3[%c0_20, %c0_21] : memref<24x32xbf16, #tpu.memory_space<vmem>>, vector<24x32xbf16>
    %cst = arith.constant dense<0.000000e+00> : vector<24x256xf32>
    %32 = tpu.matmul %31, %30, %cst {dimension_numbers = #tpu.dot_dimension_numbers<[1], [0], [0], [1], [0, 0, 1, 1], [], []>} : vector<24x32xbf16>, vector<32x256xbf16>, vector<24x256xf32> -> vector<24x256xf32>
    %c0_22 = arith.constant 0 : index
    %c0_23 = arith.constant 0 : index
    %33 = vector.load %arg4[%c0_22, %c0_23] : memref<24x1xf32, #tpu.memory_space<vmem>>, vector<24x1xf32>
    %34 = vector.broadcast %33 : vector<24x1xf32> to vector<24x256xf32>
    %35 = arith.addf %32, %34 : vector<24x256xf32>
    %36 = vector.extract_strided_slice %35 {offsets = [0, 0], sizes = [8, 256], strides = [1, 1]} : vector<24x256xf32> to vector<8x256xf32>
    %37 = arith.truncf %36 : vector<8x256xf32> to vector<8x256xbf16>
    %c0_24 = arith.constant 0 : index
    %c0_25 = arith.constant 0 : index
    %c0_26 = arith.constant 0 : index
    %38 = vector.load %arg6[%c0_24, %c0_25, %c0_26] : memref<1x8x256xbf16, #tpu.memory_space<vmem>>, vector<1x8x256xbf16>
    %39 = vector.shape_cast %38 : vector<1x8x256xbf16> to vector<8x256xbf16>
    %40 = vector.shape_cast %37 : vector<8x256xbf16> to vector<1x8x256xbf16>
    tpu.vector_store %arg6[%c0_24, %c0_25, %c0_26], %40 {strides = array<i32>} : memref<1x8x256xbf16, #tpu.memory_space<vmem>>, vector<1x8x256xbf16>,
    %41 = vector.extract_strided_slice %35 {offsets = [8, 0], sizes = [8, 256], strides = [1, 1]} : vector<24x256xf32> to vector<8x256xf32>
    %42 = arith.truncf %41 : vector<8x256xf32> to vector<8x256xbf16>
    %c0_27 = arith.constant 0 : index
    %c0_28 = arith.constant 0 : index
    %c0_29 = arith.constant 0 : index
    %43 = vector.load %arg7[%c0_27, %c0_28, %c0_29] : memref<1x8x256xbf16, #tpu.memory_space<vmem>>, vector<1x8x256xbf16>
    %44 = vector.shape_cast %43 : vector<1x8x256xbf16> to vector<8x256xbf16>
    %45 = vector.shape_cast %42 : vector<8x256xbf16> to vector<1x8x256xbf16>
    tpu.vector_store %arg7[%c0_27, %c0_28, %c0_29], %45 {strides = array<i32>} : memref<1x8x256xbf16, #tpu.memory_space<vmem>>, vector<1x8x256xbf16>,
    %46 = vector.extract_strided_slice %35 {offsets = [16, 0], sizes = [8, 256], strides = [1, 1]} : vector<24x256xf32> to vector<8x256xf32>
    %47 = arith.truncf %46 : vector<8x256xf32> to vector<8x256xbf16>
    %c0_30 = arith.constant 0 : index
    %c0_31 = arith.constant 0 : index
    %c0_32 = arith.constant 0 : index
    %48 = vector.load %arg8[%c0_30, %c0_31, %c0_32] : memref<1x8x256xbf16, #tpu.memory_space<vmem>>, vector<1x8x256xbf16>
    %49 = vector.shape_cast %48 : vector<1x8x256xbf16> to vector<8x256xbf16>
    %50 = vector.shape_cast %47 : vector<8x256xbf16> to vector<1x8x256xbf16>
    tpu.vector_store %arg8[%c0_30, %c0_31, %c0_32], %50 {strides = array<i32>} : memref<1x8x256xbf16, #tpu.memory_space<vmem>>, vector<1x8x256xbf16>,
    return
  }
  func.func @transform_0(%arg0: i32, %arg1: i32) -> (i32, i32, i32) {
    %c0_i32 = arith.constant 0 : i32
    %c0_i32_0 = arith.constant 0 : i32
    %c0_i32_1 = arith.constant 0 : i32
    return %arg0, %c0_i32, %c0_i32_0 : i32, i32, i32
  }
  func.func @transform_1(%arg0: i32, %arg1: i32) -> (i32, i32) {
    %c0_i32 = arith.constant 0 : i32
    %c0_i32_0 = arith.constant 0 : i32
    %c0_i32_1 = arith.constant 0 : i32
    return %c0_i32, %c0_i32_0 : i32, i32
  }
  func.func @transform_2(%arg0: i32, %arg1: i32) -> (i32, i32) {
    %c0_i32 = arith.constant 0 : i32
    %c0_i32_0 = arith.constant 0 : i32
    %c0_i32_1 = arith.constant 0 : i32
    return %c0_i32, %c0_i32_0 : i32, i32
  }
  func.func @transform_3(%arg0: i32, %arg1: i32) -> (i32, i32) {
    %c0_i32 = arith.constant 0 : i32
    %c0_i32_0 = arith.constant 0 : i32
    %c0_i32_1 = arith.constant 0 : i32
    return %c0_i32, %c0_i32_0 : i32, i32
  }
  func.func @transform_4(%arg0: i32, %arg1: i32) -> (i32, i32, i32) {
    %c0_i32 = arith.constant 0 : i32
    %c0_i32_0 = arith.constant 0 : i32
    return %arg0, %c0_i32, %arg1 : i32, i32, i32
  }
  func.func @transform_5(%arg0: i32, %arg1: i32) -> (i32, i32, i32) {
    %c0_i32 = arith.constant 0 : i32
    %c0_i32_0 = arith.constant 0 : i32
    return %arg0, %c0_i32, %arg1 : i32, i32, i32
  }
  func.func @transform_6(%arg0: i32, %arg1: i32) -> (i32, i32, i32) {
    %c0_i32 = arith.constant 0 : i32
    %c0_i32_0 = arith.constant 0 : i32
    return %arg0, %c0_i32, %arg1 : i32, i32, i32
  }
}

</mosaic_0001>

<bundles_post_ra>
// kernel: qed_first_layer.1
= control target key start
LH: loop header
LB: loop body
LE: loop exit
PB: predicated region body
PF: predicated region fallthrough
CT: control target
= control target key end

     0   :  { %s1103_s21 = smov 0   ;;  %s1105_s22 = smov 0   ;;  %s1235_s0 = inlined_call_operand.vmem [shape: bf16[2,4,290], index: 0, kind: input, shape index: {}]   ;;  %s1236_s1 = inlined_call_operand.vmem [shape: bf16[24,32], index: 1, kind: input, shape index: {}]   ;;  %s1237_s2 = inlined_call_operand.vmem [shape: f32[24,1], index: 2, kind: input, shape index: {}]   ;;  %s1238_s3 = inlined_call_operand.vmem [shape: bf16[2,256], index: 3, kind: input, shape index: {}]   ;;  %s1239_s4 = inlined_call_operand.vmem [shape: bf16[2,8,256], index: 4, kind: output, shape index: {0}]   ;;  %s1240_s5 = inlined_call_operand.vmem [shape: bf16[2,8,256], index: 5, kind: output, shape index: {1}]   ;;  %s1241_s6 = inlined_call_operand.vmem [shape: bf16[2,8,256], index: 6, kind: output, shape index: {2}]  }
   0x1   :  { %s1107_s23 = smov 0  }
   0x2 LB: > { %s29_s24 = sadd.s32 1, %s1047_s22  ;;  %p955_p0 = scmp.ge.s32.totalorder %s1051_s23, 1  ;;  %s1051_s23 = sphi %s1107_s23, %s17_s23   ;;  %s1047_s22 = sphi %s1105_s22, %s1243_s22   ;;  %s1043_s21 = sphi %s1103_s21, %s1242_s21  }
   0x3   : > { %p31_p1 = scmp.ge.s32.totalorder %s29_s24, 2  ;;  %p235_p2 = scmp.lt.s32.totalorder %s1051_s23, 3 }
   0x5   : > { %s1245_s24 = smov (%p31_p1, %s29_s24), 0  ;;  %p236_p3 = pnand %p955_p0, %p235_p2 }
   0x6   : > { %p287_p4 = scmp.lt.s32.totalorder (!%p236_p3), %s1043_s21, 1  ;;  %s1055_s7 = smov (!%p236_p3), 32  }
   0x7   : > { %239 = sbr.rel (%p236_p3) target bundleno = 505 (0x1f9), region = 36  ;;  %s1056_s8 = smov (!%p236_p3), 34  }
   0x8   : > { %s1057_s9 = smov (!%p236_p3), 18   ;;  %s1058_s10 = smov (!%p236_p3), 2  }
   0x9   : > { %s1059_s11 = smov (!%p236_p3), 16   ;;  %s1060_s12 = smov (!%p236_p3), 95  }
   0xa   : > { %s1061_s13 = smov (!%p236_p3), 127   ;;  %s1062_s14 = smov (!%p236_p3), 96  }
   0xb   : > { %s1063_s15 = smov (!%p236_p3), 110   ;;  %s1064_s16 = smov (!%p236_p3), 126  }
   0xc   : > { %v963_v0 = vld.sshfl [vmem:[%s1238_s3] sm:$0x11 pattern:$0x75316420]  ;;  %v337_v1 = vlaneseq  ;;  %v1053_v2 = vmov 1966171168  }
   0xd   : > { %v335_v3 = vunpack.c.l.s4 %v1053_v2  ;;  %v1054_v5 = vmov 1983009808   ;;  %v333_v7 = vcombine.high %v963_v0, %v963_v0  ;;  %s1247_s21 = smov (!%p287_p4, %s1043_s21), 1  ;;  %vm423_vm0 = vcmask 261120   ;;  %s1065_s17 = smov 112  }
   0xe   : > { %v338_v4 = vshrl.u32 %v337_v1, 7  ;;  %v366_v6 = vunpack.c.l.s4 %v1054_v5  ;;  %s983_s27 = smul.u32 6, %s1247_s21  ;;  %vm416_vm1 = vcmask 146432   ;;  %vm402_vm2 = vcmask 15360   ;;  %s1066_s18 = smov 94  }
   0xf   : > { %v336_v8 = vunpack.c.0.s8 %v335_v3  ;;  %vm430_vm3 = vcmask 277504   ;;  %vm409_vm4 = vcmask 130048   ;;  %vm546_vm5 = vcmask 900096  }
  0x10   : > { %v367_v10 = vunpack.c.0.s8 %v366_v6  ;;  %v353_v13 = vsub.s32 0, %v338_v4  ;;  %s291_s30 = scalar_lea.vmem %s1235_s0, %s983_s27  ;;  %vm572_vm6 = vcmask 785408   ;;  %vm591_vm7 = vcmask 777216  }
  0x11   : > { %v339_v9 = vsub.s32 %v336_v8, %v338_v4  ;;  %v1132_v26 = vld [vmem:[%s291_s30] sm:$0xf]  ;;  %vm621_vm8 = vcmask 1041408   ;;  %vm618_vm9 = vcmask 769024   ;;  %vm628_vm10 = vcmask 1043456  }
  0x12   : > { %v1127_v18 = vsub.s32 %v367_v10, %v338_v4  ;;  %v1134_v27 = vld [vmem:[%s291_s30] sm:$0x3f]  ;;  %vm466_vm11 = vcmask 1039360   ;;  %vm633_vm12 = vcmask 1045504   ;;  %vm493_vm13 = vcmask 1031168  }
  0x13   : > { %v340_v11 = vrot.slane %v963_v0, %v339_v9  ;;  %v347_v12 = vrot.slane %v333_v7, %v339_v9  ;;  %v575_v32 = vcombine.high %v1134_v27, %v1134_v27  ;;  %v444_v35 = vcombine.low %v1134_v27, %v1134_v27 }
  0x14   : > { %v458_v34 = vrot.slane %v1134_v27, %v1127_v18  ;;  %vm520_vm14 = vcmask 916480  }
  0x15   : > { %v349_v14 = vpack.i.b16 %v340_v11, %v340_v11  ;;  %v356_v15 = vpack.i.b16 %v347_v12, %v347_v12  ;;  %v375_v16 = vshrl.u32 %v340_v11, 16  ;;  %v382_v17 = vshrl.u32 %v347_v12, 16 }
  0x16   : > { %v582_v33 = vrot.slane %v575_v32, %v1127_v18  ;;  %v583_v37 = vcombine.low %v458_v34, %v458_v34  ;;  %v451_v38 = vrot.slane %v444_v35, %v1127_v18 }
  0x17   : > { %v354_v19 = vrot.slane %v349_v14, %v353_v13  ;;  %v361_v20 = vrot.slane %v356_v15, %v353_v13  ;;  %v376_v21 = vpack.i.b16 %v375_v16, %v375_v16  ;;  %v383_v22 = vpack.i.b16 %v382_v17, %v382_v17 }
  0x18   : > { %v584_v36 = vcombine.low %v582_v33, %v582_v33  ;;  %v459_v39 = vcombine.high %v451_v38, %v451_v38  ;;  %v1067_v14 = vmov 0  }
  0x19   : > { %v364_v23 = vcombine.low %v354_v19, %v361_v20  ;;  %v381_v24 = vrot.slane %v376_v21, %v353_v13  ;;  %v388_v25 = vrot.slane %v383_v22, %v353_v13  ;;  %724 = vmatprep.mubr.bf16.mxu0 %v1067_v14  ;;  %734 = vmatprep.mubr.bf16.mxu1 %v1067_v14  ;;  %v659_v21 = vld [vmem:[%s1237_s2] sm:$0xff]  ;;  %v660_v22 = vld [vmem:[%s1237_s2 + $0x8] sm:$0xff] }
  0x1a   : > { %1024 = vset.pattern.permute.xlu1 %v1067_v14  ;;  %1023 = vset.pattern.permute.xlu0 %v1067_v14 }
  0x1b   : > { %v1137_v28 = vrot.slane %v364_v23, %v1127_v18  ;;  %v391_v29 = vcombine.low %v381_v24, %v388_v25  ;;  %v661_v23 = vld [vmem:[%s1237_s2 + $0x10] sm:$0xff] }
  0x1d   : > { %420 = vrot.lane.b32.xlu0 %v1137_v28, %s1055_s7  ;;  %v373_v30 = vmul.bf16 %v1137_v28, %v1132_v26  ;;  %v398_v31 = vrot.slane %v391_v29, %v1127_v18 }
  0x1f   : > { %427 = vrot.lane.b32.xlu1 %v398_v31, %s1056_s8 }
  0x21   : > { %413 = vrot.lane.b32.xlu0 %v398_v31, %s1057_s9  ;;  %s973_s9 = sshll.u32 %s1247_s21, 3 }
  0x23   : > { %399 = vrot.lane.b32.xlu1 %v398_v31, %s1058_s10 }
  0x25   : > { %406 = vrot.lane.b32.xlu0 %v1137_v28, %s1059_s11 }
  0x27   : > { %587 = vrot.lane.b32.xlu1 %v458_v34, %s1060_s12 }
  0x29   : > { %589 = vrot.lane.b32.xlu0 %v584_v36, %s1060_s12 }
  0x2b   : > { %585 = vrot.lane.b32.xlu1 %v583_v37, %s1060_s12  ;;  %s300_s12 = scalar_lea.vmem %s1239_s4, %s973_s9 }
  0x2d   : > { %464 = vrot.lane.b32.xlu0 %v458_v34, %s1061_s13 }
  0x2f   : > { %462 = vrot.lane.b32.xlu1 %v459_v39, %s1061_s13 }
  0x33   : > { %460 = vrot.lane.b32.xlu1 %v451_v38, %s1061_s13 }
  0x8f   : > { %v421_v40 = vpop.permute.xlu0 %420 }
  0x90   : > { %v422_v41 = vrot.slane %v421_v40, 6 }
  0x91   : > { %v428_v42 = vpop.permute.xlu1 %427 }
  0x92   : > { %v424_v43 = vsel %vm423_vm0, %v422_v41, %v421_v40  ;;  %v429_v50 = vrot.slane %v428_v42, 6 }
  0x93   : > { %v426_v44 = vmul.bf16 %v424_v43, %v1134_v27  ;;  %v414_v45 = vpop.permute.xlu0 %413 }
  0x94   : > { %v415_v46 = vrot.slane %v414_v45, 6  ;;  %v431_v60 = vsel %vm430_vm3, %v429_v50, %v428_v42  ;;  %v441_v42 = vrot.slane %v373_v30, %v1127_v18 }
  0x95   : > { %v550_v47 = vcombine.low %v426_v44, %v426_v44  ;;  %v400_v48 = vpop.permute.xlu1 %399  ;;  %v564_v49 = vrot.slane %v426_v44, %v1127_v18  ;;  %v433_v0 = vmul.bf16 %v431_v60, %v1134_v27 }
  0x96   : > { %v417_v51 = vsel %vm416_vm1, %v415_v46, %v414_v45  ;;  %v401_v52 = vrot.slane %v400_v48, 6 }
  0x97   : > { %v419_v53 = vmul.bf16 %v417_v51, %v1134_v27  ;;  %v407_v54 = vpop.permute.xlu0 %406  ;;  %570 = vrot.lane.b32.xlu0 %v564_v49, %s1062_s14  ;;  %v557_v58 = vrot.slane %v550_v47, %v1127_v18  ;;  %v595_v4 = vcombine.low %v433_v0, %v433_v0  ;;  %v609_v10 = vrot.slane %v433_v0, %v1127_v18 }
  0x98   : > { %v403_v55 = vsel %vm402_vm2, %v401_v52, %v400_v48  ;;  %v408_v56 = vrot.slane %v407_v54, 6  ;;  %v442_v52 = vcombine.high %v441_v42, %v441_v42 }
  0x99   : > { %v405_v57 = vmul.bf16 %v403_v55, %v1134_v27  ;;  %v531_v59 = vrot.slane %v419_v53, %v1127_v18  ;;  %v524_v1 = vcombine.high %v419_v53, %v419_v53  ;;  %v602_v7 = vrot.slane %v595_v4, %v1127_v18  ;;  %v588_v24 = vpop.permute.xlu1 %587 }
  0x9a   : > { %v410_v61 = vsel %vm409_vm4, %v408_v56, %v407_v54  ;;  %v565_v9 = vcombine.high %v557_v58, %v557_v58  ;;  %v611_v12 = vcombine.low %v609_v10, %v609_v10 }
  0x9b   : > { %v412_v62 = vmul.bf16 %v410_v61, %v1134_v27  ;;  %566 = vrot.lane.b32.xlu0 %v557_v58, %s1062_s14  ;;  %540 = vrot.lane.b32.xlu1 %v531_v59, %s1063_s15  ;;  %v477_v63 = vrot.slane %v405_v57, %v1127_v18  ;;  %v538_v5 = vrot.slane %v524_v1, %v1127_v18  ;;  %v590_v25 = vpop.permute.xlu0 %589 }
  0x9c   : > { %v539_v6 = vcombine.high %v531_v59, %v531_v59  ;;  %v470_v8 = vcombine.high %v405_v57, %v405_v57  ;;  %v610_v15 = vcombine.low %v602_v7, %v602_v7  ;;  %v593_v49 = vsel %vm591_vm7, %v588_v24, %v590_v25 }
  0x9d   : > { %v497_v2 = vcombine.low %v412_v62, %v412_v62  ;;  %v485_v11 = vcombine.low %v477_v63, %v477_v63  ;;  %v511_v16 = vrot.slane %v412_v62, %v1127_v18  ;;  %v586_v27 = vpop.permute.xlu1 %585 }
  0x9e   : > { %v484_v13 = vrot.slane %v470_v8, %v1127_v18  ;;  %v592_v28 = vsel %vm591_vm7, %v586_v27, %v588_v24  ;;  %v1027_v8 = vld [vmem:[%s1236_s1] sm:$0xff]  }
  0x9f   : > { %489 = vrot.lane.b32.xlu0 %v477_v63, %s1064_s16  ;;  %v504_v3 = vrot.slane %v497_v2, %v1127_v18  ;;  %v513_v19 = vcombine.low %v511_v16, %v511_v16  ;;  %v465_v29 = vpop.permute.xlu0 %464 }
  0xa0   : > { %v486_v17 = vcombine.low %v484_v13, %v484_v13 }
  0xa1   : > { %516 = vrot.lane.b32.xlu1 %v504_v3, %s1065_s17  ;;  %v512_v20 = vcombine.low %v504_v3, %v504_v3  ;;  %v463_v31 = vpop.permute.xlu1 %462 }
  0xa2   : > { %v468_v30 = vsel %vm466_vm11, %v463_v31, %v465_v29 }
  0xa3   : > { %544 = vrot.lane.b32.xlu0 %v538_v5, %s1063_s15  ;;  %v627_v59 = vsel %vm621_vm8, %v442_v52, %v468_v30 }
  0xa5   : > { %542 = vrot.lane.b32.xlu1 %v539_v6, %s1063_s15  ;;  %v461_v33 = vpop.permute.xlu1 %460  ;;  %s320_s15 = scalar_lea.vmem %s1241_s6, %s973_s9 }
  0xa6   : > { %v467_v60 = vsel %vm466_vm11, %v461_v33, %v463_v31 }
  0xa7   : > { %614 = vrot.lane.b32.xlu0 %v602_v7, %s1066_s18  ;;  %v624_v2 = vsel %vm621_vm8, %v441_v42, %v467_v60 }
  0xa9   : > { %568 = vrot.lane.b32.xlu1 %v565_v9, %s1062_s14  ;;  %v1028_v9 = vld [vmem:[%s1236_s1 + $0x8] ss:$0 sps:$4 sm:$0xff]  }
  0xab   : > { %487 = vrot.lane.b32.xlu0 %v485_v11, %s1064_s16 }
  0xad   : > { %616 = vrot.lane.b32.xlu1 %v611_v12, %s1066_s18 }
  0xaf   : > { %612 = vrot.lane.b32.xlu0 %v610_v15, %s1066_s18 }
  0xb1   : > { %491 = vrot.lane.b32.xlu1 %v486_v17, %s1064_s16 }
  0xb3   : > { %518 = vrot.lane.b32.xlu0 %v513_v19, %s1065_s17 }
  0xb5   : > { %514 = vrot.lane.b32.xlu1 %v512_v20, %s1065_s17  ;;  %s310_s17 = scalar_lea.vmem %s1240_s5, %s973_s9 }
  0xb7   : > { %664 = vperm.xlu0 %1023, %v659_v21  }
  0xb9   : > { %669 = vperm.xlu1 %1024, %v660_v22  }
  0xbd   : > { %674 = vperm.xlu1 %1024, %v661_v23  }
 0x109   : > { %v571_v32 = vpop.permute.xlu0 %570 }
 0x10d   : > { %v567_v34 = vpop.permute.xlu0 %566  ;;  %v541_v35 = vpop.permute.xlu1 %540 }
 0x111   : > { %v490_v36 = vpop.permute.xlu0 %489 }
 0x113   : > { %v517_v37 = vpop.permute.xlu1 %516 }
 0x115   : > { %v545_v38 = vpop.permute.xlu0 %544 }
 0x117   : > { %v543_v39 = vpop.permute.xlu1 %542 }
 0x118   : > { %v548_v43 = vsel %vm546_vm5, %v543_v39, %v545_v38  ;;  %v547_v48 = vsel %vm546_vm5, %v541_v35, %v543_v39 }
 0x119   : > { %v615_v40 = vpop.permute.xlu0 %614 }
 0x11b   : > { %v569_v41 = vpop.permute.xlu1 %568 }
 0x11c   : > { %v573_v44 = vsel %vm572_vm6, %v567_v34, %v569_v41  ;;  %v574_v45 = vsel %vm572_vm6, %v569_v41, %v571_v32 }
 0x11d   : > { %v645_v46 = vsel %vm621_vm8, %v548_v43, %v574_v45  ;;  %v488_v47 = vpop.permute.xlu0 %487  ;;  %v642_v50 = vsel %vm621_vm8, %v547_v48, %v573_v44 }
 0x11e   : > { %v649_v18 = vsel %vm628_vm10, %v645_v46, %v593_v49  ;;  %v647_v56 = vsel %vm628_vm10, %v642_v50, %v592_v28  ;;  %v494_v62 = vsel %vm493_vm13, %v488_v47, %v490_v36 }
 0x11f   : > { %v617_v51 = vpop.permute.xlu1 %616  ;;  %v630_v6 = vsel %vm628_vm10, %v624_v2, %v494_v62 }
 0x120   : > { %v620_v26 = vsel %vm618_vm9, %v615_v40, %v617_v51 }
 0x121   : > { %v613_v53 = vpop.permute.xlu0 %612  ;;  %v654_v54 = vsel %vm633_vm12, %v649_v18, %v620_v26 }
 0x122   : > { %v619_v55 = vsel %vm618_vm9, %v613_v53, %v615_v40  ;;  %704 = vmatprep.subr.bf16.mxu0 %v654_v54  ;;  %979 = vmatprep.subr.bf16.mxu1 %v654_v54 }
 0x123   : > { %v492_v57 = vpop.permute.xlu1 %491  ;;  %v651_v58 = vsel %vm633_vm12, %v647_v56, %v619_v55 }
 0x124   : > { %v495_v61 = vsel %vm493_vm13, %v490_v36, %v492_v57  ;;  %705 = vmatpush1.bf16.msra.mxu0 %v651_v58  ;;  %981 = vmatpush1.bf16.msra.mxu1 %v651_v58 }
 0x125   : > { %v519_v63 = vpop.permute.xlu0 %518  ;;  %v632_v0 = vsel %vm628_vm10, %v627_v59, %v495_v61 }
 0x126   : > { %v522_v1 = vsel %vm520_vm14, %v517_v37, %v519_v63 }
 0x127   : > { %v515_v3 = vpop.permute.xlu1 %514  ;;  %v638_v4 = vsel %vm633_vm12, %v632_v0, %v522_v1 }
 0x128   : > { %v521_v5 = vsel %vm520_vm14, %v515_v3, %v517_v37  ;;  %706 = vmatprep.subr.bf16.mxu0 %v638_v4  ;;  %980 = vmatprep.subr.bf16.mxu1 %v638_v4 }
 0x129   : > { %v635_v7 = vsel %vm633_vm12, %v630_v6, %v521_v5 }
 0x12a   : > { %707 = vmatpush1.bf16.msra.mxu0 %v635_v7  ;;  %982 = vmatpush1.bf16.msra.mxu1 %v635_v7 }
 0x12d   : > { %966 = vmatmul.mubr.msk.bf16.vlgmr.msra.gmra.mxu0 %vm423_vm0, %v1027_v8  ;;  %967 = vmatmul.mubr.msk.bf16.vlgmr.msra.gmra.mxu1 %vm423_vm0, %v1028_v9 }
 0x132   : > { %v665_v12 = vpop.permute.xlu0 %664 }
 0x134   : > { %v670_v10 = vpop.permute.xlu1 %669 }
 0x138   : > { %v675_v11 = vpop.permute.xlu1 %674 }
 0x1ed   : > { %v726_v13 = vpop.f32.mrf.mxu0  ;;  %v736_v14 = vpop.f32.mrf.mxu1 }
 0x1ee   : > { %v737_v15 = vadd.f32 %v736_v14, %v675_v11  ;;  %v727_v19 = vadd.f32 %v726_v13, %v665_v12 }
 0x1ef   : > { %v728_v16 = vpop.f32.mrf.mxu0  ;;  %v738_v17 = vpop.f32.mrf.mxu1 }
 0x1f0   : > { %v729_v20 = vadd.f32 %v728_v16, %v665_v12  ;;  %v739_v21 = vadd.f32 %v738_v17, %v675_v11 }
 0x1f1   : > { %v730_v22 = vpop.f32.mrf.mxu0  ;;  %v740_v23 = vpop.f32.mrf.mxu1 }
 0x1f2   : > { %v976_v24 = vpack.c.bf16 %v729_v20, %v727_v19  ;;  %v978_v25 = vpack.c.bf16 %v739_v21, %v737_v15  ;;  %v731_v31 = vadd.f32 %v730_v22, %v670_v10 }
 0x1f3   : > { %v732_v27 = vpop.f32.mrf.mxu0  ;;  %v741_v29 = vpop.f32.mrf.mxu1 }
 0x1f4   : > { %751 = vst [vmem:[%s300_s12] sm:$0xff] %v976_v24  ;;  %769 = vst [vmem:[%s320_s15] sm:$0xff] %v978_v25  ;;  %v733_v32 = vadd.f32 %v732_v27, %v670_v10 }
 0x1f6   : > { %v977_v33 = vpack.c.bf16 %v733_v32, %v731_v31 }
 0x1f8   : > { %760 = vst [vmem:[%s310_s17] sm:$0xff] %v977_v33 }
 0x1f9 PF: > { %s17_s23 = sadd.s32 1, %s1051_s23   ;;  %s1242_s21 = smov %s1047_s22 }
 0x1fa   : > { %p14_p5 = scmp.ge.s32.totalorder %s17_s23, 4   ;;  %s1243_s22 = smov %s1245_s24 }
 0x1fc   :  { %16 = sbr.rel (!%p14_p5) target bundleno = 2 (0x2), region = 90 }

</bundles_post_ra>
